<compile_context>
chip_gen: v5e
topology: v5e:2x2
jax: 0.10.0
libtpu: 0.0.40
codegen_flags: <defaults>
</compile_context>

<pallas_src>
import jax
import jax.numpy as jnp
from jax.experimental import pallas as pl
from jax.experimental.pallas import tpu as pltpu

EPS = 1e-5  # nn.BatchNorm2d default


def _round_up(a, b):
    return (a + b - 1) // b * b


def _pick_tile(padded, align, max_tile):
    """Largest multiple of `align` that divides `padded` and is <= max_tile."""
    best = align
    t = align
    limit = min(padded, max_tile)
    while t <= limit:
        if padded % t == 0:
            best = t
        t += align
    return best


def _stats_kernel(x_ref, sum_ref, sq_ref):
    # x_ref: (tile_r, tile_hw) input dtype; sum/sq: (tile_r, 1) f32 accumulators
    # resident across the hw (reduction) grid axis.
    j = pl.program_id(1)

    @pl.when(j == 0)
    def _():
        sum_ref[...] = jnp.zeros_like(sum_ref)
        sq_ref[...] = jnp.zeros_like(sq_ref)

    x = x_ref[...].astype(jnp.float32)
    sum_ref[...] += jnp.sum(x, axis=1, keepdims=True)
    sq_ref[...] += jnp.sum(x * x, axis=1, keepdims=True)


def _apply_kernel(x_ref, scale_ref, shift_ref, o_ref):
    # Single FMA per element: out = x * scale_row + shift_row.
    x = x_ref[...].astype(jnp.float32)
    o_ref[...] = (x * scale_ref[...] + shift_ref[...]).astype(o_ref.dtype)


def conditional_batchnorm2d(x_nchw, c, ww, wb, bw, bb):
    """x_nchw: (N, C, H, W); c: (N, K); ww/bw: (C, K); wb/bb: (C,)."""
    N, C, H, W = x_nchw.shape
    HW = H * W
    R = N * C

    # --- lane-dense 2-D layout, padded only to (8, 128) alignment ------------
    hw_pad = _round_up(HW, 128)
    r_pad = _round_up(R, 8)
    tile_hw = _pick_tile(hw_pad, 128, 2048)   # lane-dense, <= 2048 lanes
    tile_r = _pick_tile(r_pad, 8, 256)        # <= 256 rows -> ~2 MiB f32 blocks

    x2 = x_nchw.reshape(R, HW)                # free reshape (contiguous NCHW)
    if r_pad != R or hw_pad != HW:
        x2 = jnp.pad(x2, ((0, r_pad - R), (0, hw_pad - HW)))  # zeros: neutral for sums

    nr = r_pad // tile_r
    nhw = hw_pad // tile_hw

    # --- pass 1: per-row sum / sumsq (one HBM stream of x) -------------------
    sums, sqs = pl.pallas_call(
        _stats_kernel,
        out_shape=(
            jax.ShapeDtypeStruct((r_pad, 1), jnp.float32),
            jax.ShapeDtypeStruct((r_pad, 1), jnp.float32),
        ),
        grid_spec=pltpu.PrefetchScalarGridSpec(
            num_scalar_prefetch=0,
            grid=(nr, nhw),                   # reduction axis last
            in_specs=[pl.BlockSpec((tile_r, tile_hw), lambda i, j: (i, j))],
            out_specs=[
                pl.BlockSpec((tile_r, 1), lambda i, j: (i, 0)),
                pl.BlockSpec((tile_r, 1), lambda i, j: (i, 0)),
            ],
        ),
        compiler_params=pltpu.CompilerParams(
            dimension_semantics=("parallel", "arbitrary"),
            vmem_limit_bytes=32 * 1024 * 1024,
        ),
    )(x2)

    # --- tiny per-(n, c) math in the wrapper (hoisted out of the kernel) -----
    count = jnp.float32(N * HW)
    sum_nc = sums[:R, 0].reshape(N, C)
    sq_nc = sqs[:R, 0].reshape(N, C)
    mean_c = jnp.sum(sum_nc, axis=0) / count                        # (C,)
    ex2_c = jnp.sum(sq_nc, axis=0) / count
    var_c = jnp.maximum(ex2_c - mean_c * mean_c, 0.0)               # biased variance
    inv_std = jax.lax.rsqrt(var_c + EPS)                            # (C,)

    cf = c.astype(jnp.float32)
    gamma = cf @ ww.astype(jnp.float32).T + wb.astype(jnp.float32)  # (N, C)
    beta = cf @ bw.astype(jnp.float32).T + bb.astype(jnp.float32)   # (N, C)

    scale = gamma * inv_std[None, :]                                # (N, C)
    shift = beta - mean_c[None, :] * scale                          # (N, C)

    scale_r = scale.reshape(R, 1)
    shift_r = shift.reshape(R, 1)
    if r_pad != R:
        scale_r = jnp.pad(scale_r, ((0, r_pad - R), (0, 0)))
        shift_r = jnp.pad(shift_r, ((0, r_pad - R), (0, 0)))

    # --- pass 2: apply (second and last HBM stream of x) ---------------------
    out2 = pl.pallas_call(
        _apply_kernel,
        out_shape=jax.ShapeDtypeStruct((r_pad, hw_pad), x2.dtype),
        grid_spec=pltpu.PrefetchScalarGridSpec(
            num_scalar_prefetch=0,
            grid=(nr, nhw),
            in_specs=[
                pl.BlockSpec((tile_r, tile_hw), lambda i, j: (i, j)),
                pl.BlockSpec((tile_r, 1), lambda i, j: (i, 0)),
                pl.BlockSpec((tile_r, 1), lambda i, j: (i, 0)),
            ],
            out_specs=pl.BlockSpec((tile_r, tile_hw), lambda i, j: (i, j)),
        ),
        compiler_params=pltpu.CompilerParams(
            dimension_semantics=("parallel", "parallel"),
            vmem_limit_bytes=32 * 1024 * 1024,
        ),
    )(x2, scale_r, shift_r)

    return out2[:R, :HW].reshape(N, C, H, W)


def _reference(x_nchw, c, ww, wb, bw, bb):
    mean = jnp.mean(x_nchw, axis=(0, 2, 3), keepdims=True)
    var = jnp.mean((x_nchw - mean) ** 2, axis=(0, 2, 3), keepdims=True)
    x_hat = (x_nchw - mean) * jax.lax.rsqrt(var + EPS)
    gamma = c @ ww.T + wb
    beta = c @ bw.T + bb
    return gamma[:, :, None, None] * x_hat + beta[:, :, None, None]


def _orthogonal(key, rows, cols):
    # deterministic orthogonal-style init (matches nn.init.orthogonal_ intent)
    big, small = max(rows, cols), min(rows, cols)
    a = jax.random.normal(key, (big, small), dtype=jnp.float32)
    q, _ = jnp.linalg.qr(a)
    q = q[:big, :small]
    return q if rows >= cols else q.T


if __name__ == "__main__":
    num_class, num_feature = 8, 4
    N, H, W = 2, 16, 16

    key = jax.random.PRNGKey(0)
    kx, kc, kw, kwb, kbb = jax.random.split(key, 5)

    x = jax.random.normal(kx, (N, num_feature, H, W), dtype=jnp.float32)  # NCHW
    c = jax.random.normal(kc, (N, num_class), dtype=jnp.float32)

    # self.weight = nn.Linear(numClass, numFeature): weight (F,K) orthogonal, bias default
    ww = _orthogonal(kw, num_feature, num_class)
    wb = jax.random.uniform(kwb, (num_feature,), jnp.float32,
                            -1.0 / num_class ** 0.5, 1.0 / num_class ** 0.5)
    # self.bias = nn.Linear(numClass, numFeature): weight zeros, bias default
    bw = jnp.zeros((num_feature, num_class), jnp.float32)
    bb = jax.random.uniform(kbb, (num_feature,), jnp.float32,
                            -1.0 / num_class ** 0.5, 1.0 / num_class ** 0.5)

    out = conditional_batchnorm2d(x, c, ww, wb, bw, bb)
    jax.block_until_ready(out)

    ref = _reference(x, c, ww, wb, bw, bb)
    assert out.shape == (N, num_feature, H, W)
    assert jnp.allclose(out, ref, rtol=1e-3, atol=1e-3)

    print("KERNEL_OK")
</pallas_src>

<mosaic_0001>
module attributes {stable_mosaic.version = 11 : i64} {
  func.func @_stats_kernel(%arg0: i32, %arg1: i32, %arg2: memref<8x256xf32, #tpu.memory_space<vmem>>, %arg3: memref<8x1xf32, #tpu.memory_space<vmem>>, %arg4: memref<8x1xf32, #tpu.memory_space<vmem>>) attributes {dimension_semantics = [#tpu.dimension_semantics<parallel>, #tpu.dimension_semantics<arbitrary>], iteration_bounds = array<i64: 1, 1>, scalar_prefetch = 0 : i64, scratch_operands = 0 : i64, tpu.core_type = #tpu.core_type<tc>, window_params = [{transform_indices = @transform_0, window_bounds = array<i64: 8, 256>}, {transform_indices = @transform_1, window_bounds = array<i64: 8, 1>}, {transform_indices = @transform_2, window_bounds = array<i64: 8, 1>}]} {
    %c0_i32 = arith.constant 0 : i32
    %0 = arith.cmpi eq, %arg1, %c0_i32 : i32
    %1 = arith.extui %0 : i1 to i32
    %c0_i32_0 = arith.constant 0 : i32
    %2 = arith.cmpi ne, %1, %c0_i32_0 : i32
    scf.if %2 {
      %cst_11 = arith.constant 0.000000e+00 : f32
      %15 = vector.broadcast %cst_11 : f32 to vector<8x1xf32>
      %c0_12 = arith.constant 0 : index
      %c0_13 = arith.constant 0 : index
      %16 = vector.load %arg3[%c0_12, %c0_13] : memref<8x1xf32, #tpu.memory_space<vmem>>, vector<8x1xf32>
      tpu.vector_store %arg3[%c0_12, %c0_13], %15 {strides = array<i32>} : memref<8x1xf32, #tpu.memory_space<vmem>>, vector<8x1xf32>,
      %cst_14 = arith.constant 0.000000e+00 : f32
      %17 = vector.broadcast %cst_14 : f32 to vector<8x1xf32>
      %c0_15 = arith.constant 0 : index
      %c0_16 = arith.constant 0 : index
      %18 = vector.load %arg4[%c0_15, %c0_16] : memref<8x1xf32, #tpu.memory_space<vmem>>, vector<8x1xf32>
      tpu.vector_store %arg4[%c0_15, %c0_16], %17 {strides = array<i32>} : memref<8x1xf32, #tpu.memory_space<vmem>>, vector<8x1xf32>,
    } else {
    }
    %c0 = arith.constant 0 : index
    %c0_1 = arith.constant 0 : index
    %3 = vector.load %arg2[%c0, %c0_1] : memref<8x256xf32, #tpu.memory_space<vmem>>, vector<8x256xf32>
    %c0_2 = arith.constant 0 : index
    %c0_3 = arith.constant 0 : index
    %4 = vector.load %arg3[%c0_2, %c0_3] : memref<8x1xf32, #tpu.memory_space<vmem>>, vector<8x1xf32>
    %cst = arith.constant dense<0.000000e+00> : vector<8xf32>
    %5 = vector.multi_reduction <add>, %3, %cst [1] : vector<8x256xf32> to vector<8xf32>
    %6 = vector.shape_cast %5 : vector<8xf32> to vector<8x1xf32>
    %7 = arith.addf %4, %6 : vector<8x1xf32>
    %c0_4 = arith.constant 0 : index
    %c0_5 = arith.constant 0 : index
    %8 = vector.load %arg3[%c0_4, %c0_5] : memref<8x1xf32, #tpu.memory_space<vmem>>, vector<8x1xf32>
    tpu.vector_store %arg3[%c0_4, %c0_5], %7 {strides = array<i32>} : memref<8x1xf32, #tpu.memory_space<vmem>>, vector<8x1xf32>,
    %c0_6 = arith.constant 0 : index
    %c0_7 = arith.constant 0 : index
    %9 = vector.load %arg4[%c0_6, %c0_7] : memref<8x1xf32, #tpu.memory_space<vmem>>, vector<8x1xf32>
    %10 = arith.mulf %3, %3 : vector<8x256xf32>
    %cst_8 = arith.constant dense<0.000000e+00> : vector<8xf32>
    %11 = vector.multi_reduction <add>, %10, %cst_8 [1] : vector<8x256xf32> to vector<8xf32>
    %12 = vector.shape_cast %11 : vector<8xf32> to vector<8x1xf32>
    %13 = arith.addf %9, %12 : vector<8x1xf32>
    %c0_9 = arith.constant 0 : index
    %c0_10 = arith.constant 0 : index
    %14 = vector.load %arg4[%c0_9, %c0_10] : memref<8x1xf32, #tpu.memory_space<vmem>>, vector<8x1xf32>
    tpu.vector_store %arg4[%c0_9, %c0_10], %13 {strides = array<i32>} : memref<8x1xf32, #tpu.memory_space<vmem>>, vector<8x1xf32>,
    return
  }
  func.func @transform_0(%arg0: i32, %arg1: i32) -> (i32, i32) {
    %c0_i32 = arith.constant 0 : i32
    return %arg0, %arg1 : i32, i32
  }
  func.func @transform_1(%arg0: i32, %arg1: i32) -> (i32, i32) {
    %c0_i32 = arith.constant 0 : i32
    %c0_i32_0 = arith.constant 0 : i32
    return %arg0, %c0_i32 : i32, i32
  }
  func.func @transform_2(%arg0: i32, %arg1: i32) -> (i32, i32) {
    %c0_i32 = arith.constant 0 : i32
    %c0_i32_0 = arith.constant 0 : i32
    return %arg0, %c0_i32 : i32, i32
  }
}

</mosaic_0001>

<bundles_post_ra>
// kernel: tpu_custom_call.1
= control target key start
LH: loop header
LB: loop body
LE: loop exit
PB: predicated region body
PF: predicated region fallthrough
CT: control target
= control target key end

     0   :  { %8 = vsyncpa [#allocation3], 0  ;;  %s85_s12 = smov [#allocation2]   ;;  %s127_s0 = inlined_call_operand.hbm [shape: f32[8,256], index: 0, kind: input, shape index: {}]   ;;  %s128_s1 = inlined_call_operand.vmem [shape: f32[8,1], index: 1, kind: output, shape index: {0}]   ;;  %s129_s2 = inlined_call_operand.vmem [shape: f32[8,1], index: 2, kind: output, shape index: {1}]  }
   0x1   :  { %s14_s11 = sshll.u32 %s127_s0, 4  ;;  %s16_s13 = sshll.u32 %s85_s12, 4  ;;  %s15_s11 = int_to_ptr.hbm [resolvable:$true] %s14_s11  ;;  %s17_s13 = int_to_ptr.vmem [resolvable:$true] %s16_s13 }
   0x2   :  { %19 = dma.hbm_to_vmem [thread:$0]  %s15_s11, 256, %s17_s13, [#allocation3]  }
   0x3   :  { %83 = dma.done.wait [#allocation3], 256  }
   0x4   :  { %84 = vsyncadd [#allocation3], 4294967040  ;;  %vm28_vm0 = vcmask 7168   ;;  %v86_v0 = vmov 0.0   ;;  %v31_v1 = vld [vmem:[#allocation2] sm:$0xff]  ;;  %v32_v2 = vld [vmem:[#allocation2 + $0x8] sm:$0xff] }
   0x5   :  { %29 = vst.msk [vmem:[%s128_s1] sm:$0xff] %vm28_vm0, %v86_v0  ;;  %v34_v3 = vadd.f32 %v32_v2, %v31_v1  ;;  %v41_v4 = vmul.f32 %v31_v1, %v31_v1  ;;  %v42_v5 = vmul.f32 %v32_v2, %v32_v2 }
   0x6   :  { %30 = vst.msk [vmem:[%s129_s2] sm:$0xff] %vm28_vm0, %v86_v0 }
   0x7   :  { %35 = vadd.xlane.f32.xlu0 %v34_v3  ;;  %v43_v6 = vadd.f32 %v42_v5, %v41_v4 }
   0xc   :  { %v33_v7 = vld [vmem:[%s128_s1] sm:$0xff] }
   0xd   :  { %v40_v10 = vld [vmem:[%s129_s2] sm:$0xff] }
   0xf   :  { %44 = vadd.xlane.f32.xlu0 %v43_v6 }
  0x7a   :  { %v36_v8 = vpop.xlane.xlu0 %35 }
  0x7b   :  { %v37_v9 = vadd.f32 %v36_v8, %v33_v7 }
  0x7d   :  { %39 = vst.msk [vmem:[%s128_s1] sm:$0xff] %vm28_vm0, %v37_v9 }
  0x82   :  { %v45_v11 = vpop.xlane.xlu0 %44 }
  0x83   :  { %v46_v12 = vadd.f32 %v45_v11, %v40_v10 }
  0x85   :  { %47 = vst.msk [vmem:[%s129_s2] sm:$0xff] %vm28_vm0, %v46_v12 }
  0x86   :  { %56 = vsyncpa [#allocation3], 1 }

</bundles_post_ra>
